<compile_context>
chip_gen: v6e
topology: v6e:2x2x1
jax: 0.10.0
libtpu: 0.0.40
codegen_flags: <defaults>
</compile_context>

<pallas_src>
import jax
import jax.numpy as jnp
from jax import lax
from jax.experimental import pallas as pl
from jax.experimental.pallas import tpu as pltpu


def _round_up(x, m):
    return (x + m - 1) // m * m


# ---------------- kernel 1: conv-as-matmul + folded BatchNorm + ReLU ----------------

def _conv_bn_relu_kernel(p_ref, w_ref, scale_ref, shift_ref, o_ref):
    # p_ref:        (tm, Kp)  bf16 im2col rows (one row per conv output position)
    # w_ref:        (Kp, F)   bf16 reshaped conv weight
    # scale/shift:  (1, F)    f32 folded BatchNorm affine
    acc = jnp.dot(p_ref[...], w_ref[...], preferred_element_type=jnp.float32)   # MXU, f32 acc
    o_ref[...] = jnp.maximum(acc * scale_ref[...] + shift_ref[...], 0.0)        # BN + ReLU epilogue


def conv_bn_relu(patches, w_mat, scale, shift, *, tm=None):
    M, kp = patches.shape
    f_out = w_mat.shape[1]
    if tm is None:
        # Large tiles amortize the ~0.35us/grid-step overhead (v5e/v6e); keep >= 2 grid steps
        # so the "parallel" row axis can be split across v7x's two TensorCores.
        tm = 512 if M >= 4096 else 256 if M >= 256 else 128
    grid = (pl.cdiv(M, tm),)

    return pl.pallas_call(
        _conv_bn_relu_kernel,
        out_shape=jax.ShapeDtypeStruct((M, f_out), jnp.float32),
        grid=grid,
        in_specs=[
            pl.BlockSpec((tm, kp), lambda i: (i, 0)),
            pl.BlockSpec((kp, f_out), lambda i: (0, 0)),
            pl.BlockSpec((1, f_out), lambda i: (0, 0)),
            pl.BlockSpec((1, f_out), lambda i: (0, 0)),
        ],
        out_specs=pl.BlockSpec((tm, f_out), lambda i: (i, 0)),
        compiler_params=pltpu.CompilerParams(dimension_semantics=("parallel",)),
    )(patches, w_mat,
      scale.reshape(1, f_out).astype(jnp.float32),
      shift.reshape(1, f_out).astype(jnp.float32))


# ---------------- kernel 2: 3x3 stride-2 max pool (pad=1), no XLA pad pass ----------------

def _maxpool_3x3_s2_kernel(x_ref, o_ref, pad_ref):
    # x_ref:   (1, hp, 2, wc, C)  post-ReLU conv features; H rows regrouped as (pooled row, parity)
    # o_ref:   (1, hp, wc, C)     stride-2 3-window max over H, *dense* 3-window max over W
    #                             (the W stride-2 subsample is fused into the final transpose)
    # pad_ref: (1, hp, wc+2, C)   VMEM scratch: W zero-padded H-pooled rows
    #                             (zero pad == -inf pad here since inputs are >= 0)
    hp, wc = o_ref.shape[1], o_ref.shape[2]

    even = x_ref[:, :, 0, :, :]                    # conv rows 2i
    odd = x_ref[:, :, 1, :, :]                     # conv rows 2i+1
    base = jnp.maximum(even, odd)                  # covers rows {2i, 2i+1}

    pad_ref[...] = jnp.zeros_like(pad_ref)
    # pooled H row 0: window rows {-1, 0, 1} -> max(x0, x1) (row -1 is zero padding)
    pad_ref[:, 0:1, 1:wc + 1, :] = base[:, 0:1]
    # pooled H row i >= 1: window rows {2i-1, 2i, 2i+1} -> max(base[i], odd[i-1])
    pad_ref[:, 1:, 1:wc + 1, :] = jnp.maximum(base[:, 1:], odd[:, :hp - 1])

    # W window max from three shifted ref slices (vector-load slots, no value relayout)
    left = pad_ref[:, :, 0:wc, :]
    mid = pad_ref[:, :, 1:wc + 1, :]
    right = pad_ref[:, :, 2:wc + 2, :]
    o_ref[...] = jnp.maximum(jnp.maximum(left, mid), right)


def maxpool_3x3_s2_p1(feat):
    # feat: (B, hc, wc, C) NHWC, post-ReLU (values >= 0)
    B, hc, wc, C = feat.shape
    hp = (hc - 1) // 2 + 1
    wp = (wc - 1) // 2 + 1
    hc_e = 2 * hp
    if hc_e != hc:  # odd hc: one extra zero row (safe post-ReLU); no-op for the test shapes
        feat = jnp.pad(feat, ((0, 0), (0, hc_e - hc), (0, 0), (0, 0)))
    feat5 = feat.reshape(B, hp, 2, wc, C)          # free layout reshape: rows -> (pooled row, parity)

    # TODO(synk): at large resolutions (v7x, 64 MiB VMEM) add an H-tile grid axis here.
    pooled = pl.pallas_call(
        _maxpool_3x3_s2_kernel,
        out_shape=jax.ShapeDtypeStruct((B, hp, wc, C), jnp.float32),
        grid=(B,),
        in_specs=[pl.BlockSpec((1, hp, 2, wc, C), lambda b: (b, 0, 0, 0, 0))],
        out_specs=pl.BlockSpec((1, hp, wc, C), lambda b: (b, 0, 0, 0)),
        scratch_shapes=[pltpu.VMEM((1, hp, wc + 2, C), jnp.float32)],
        compiler_params=pltpu.CompilerParams(dimension_semantics=("parallel",)),
    )(feat5)

    # W stride-2 subsample; this slice fuses with the NHWC->NCHW transpose done by the caller.
    return pooled[:, :, 0:2 * wp - 1:2, :]         # (B, hp, wp, C)


# ------------------------------------- forward wrapper -------------------------------------

def image_encoder_forward(img, conv_weight, gamma, beta, running_mean, running_var, eps=1e-5):
    """img: (B, 3, H, W) NCHW. Returns (B, F, Hpool, Wpool) NCHW, matching the PyTorch module."""
    B, cin, H, W = img.shape
    f_out = conv_weight.shape[0]
    K, S, P = 7, 2, 1
    ho = (H + 2 * P - K) // S + 1
    wo = (W + 2 * P - K) // S + 1
    kdim = K * K * cin
    kp = _round_up(kdim, 128)          # MXU/bf16-clean contraction depth (147 -> 256)

    # im2col in bf16, built directly at the padded contraction width (single materialization).
    xp = jnp.pad(img, ((0, 0), (0, 0), (P, P), (P, P)))
    xp = jnp.transpose(xp, (0, 2, 3, 1)).astype(jnp.bfloat16)     # (B, H+2P, W+2P, Cin)
    cols = []
    for kh in range(K):
        for kw in range(K):
            cols.append(lax.slice(
                xp, (0, kh, kw, 0),
                (B, kh + S * (ho - 1) + 1, kw + S * (wo - 1) + 1, cin),
                (1, S, S, 1)))                                    # (B, Ho, Wo, Cin)
    cols.append(jnp.zeros((B, ho, wo, kp - kdim), jnp.bfloat16))  # zero-fill K padding
    patches = jnp.concatenate(cols, axis=-1).reshape(B * ho * wo, kp)

    # conv weight (F, Cin, KH, KW) -> (KH*KW*Cin, F), K padded, bf16 (matches patch column order)
    w_mat = jnp.transpose(conv_weight, (2, 3, 1, 0)).reshape(kdim, f_out)
    w_mat = jnp.pad(w_mat, ((0, kp - kdim), (0, 0))).astype(jnp.bfloat16)

    # fold eval-mode BatchNorm into per-channel scale & shift
    scale = gamma / jnp.sqrt(running_var + eps)
    shift = beta - running_mean * scale

    conv_rows = conv_bn_relu(patches, w_mat, scale, shift)        # (B*Ho*Wo, F) f32
    feat = conv_rows.reshape(B, ho, wo, f_out)                    # NHWC, channels on lanes

    pooled = maxpool_3x3_s2_p1(feat)                              # (B, Hp, Wp, F)
    return jnp.transpose(pooled, (0, 3, 1, 2))                    # NCHW, as in PyTorch


# ------------------------------------------ main ------------------------------------------

if __name__ == "__main__":
    key = jax.random.PRNGKey(0)
    k_img, k_w, k_g, k_b, k_m, k_v = jax.random.split(key, 6)

    B, Cin, H, W = 2, 3, 32, 32
    F_OUT = 128                         # num_init_features; 128 -> lane-dense channel axis

    img = jax.random.normal(k_img, (B, Cin, H, W), jnp.float32)
    conv_weight = 0.1 * jax.random.normal(k_w, (F_OUT, Cin, 7, 7), jnp.float32)
    gamma = 1.0 + 0.1 * jax.random.normal(k_g, (F_OUT,), jnp.float32)
    beta = 0.1 * jax.random.normal(k_b, (F_OUT,), jnp.float32)
    running_mean = 0.1 * jax.random.normal(k_m, (F_OUT,), jnp.float32)
    running_var = jax.random.uniform(k_v, (F_OUT,), jnp.float32, minval=0.5, maxval=1.5)

    fwd = jax.jit(image_encoder_forward)
    out = jax.block_until_ready(fwd(img, conv_weight, gamma, beta, running_mean, running_var))

    # conv: 32 -> 14 (k7 s2 p1); pool: 14 -> 7 (k3 s2 p1)
    assert out.shape == (B, F_OUT, 7, 7), out.shape
    assert bool(jnp.all(jnp.isfinite(out)))

    # loose parity check vs an f32 XLA reference (kernel uses bf16 MXU operands, f32 accumulation)
    conv_ref = lax.conv_general_dilated(
        img, conv_weight, window_strides=(2, 2), padding=((1, 1), (1, 1)),
        dimension_numbers=("NCHW", "OIHW", "NCHW"))
    scale_ref = gamma / jnp.sqrt(running_var + 1e-5)
    shift_ref = beta - running_mean * scale_ref
    relu_ref = jnp.maximum(conv_ref * scale_ref[None, :, None, None]
                           + shift_ref[None, :, None, None], 0.0)
    pool_ref = lax.reduce_window(relu_ref, -jnp.inf, lax.max,
                                 (1, 1, 3, 3), (1, 1, 2, 2),
                                 ((0, 0), (0, 0), (1, 1), (1, 1)))
    assert bool(jnp.allclose(out, pool_ref, rtol=0.1, atol=0.1)), \
        float(jnp.max(jnp.abs(out - pool_ref)))

    print("KERNEL_OK")
</pallas_src>

<mosaic_0001>
module attributes {stable_mosaic.version = 11 : i64} {
  func.func @_conv_bn_relu_kernel(%arg0: i32, %arg1: memref<256x256xbf16, #tpu.memory_space<vmem>>, %arg2: memref<256x128xbf16, #tpu.memory_space<vmem>>, %arg3: memref<1x128xf32, #tpu.memory_space<vmem>>, %arg4: memref<1x128xf32, #tpu.memory_space<vmem>>, %arg5: memref<256x128xf32, #tpu.memory_space<vmem>>) attributes {dimension_semantics = [#tpu.dimension_semantics<parallel>], iteration_bounds = array<i64: 2>, scalar_prefetch = 0 : i64, scratch_operands = 0 : i64, tpu.core_type = #tpu.core_type<tc>, window_params = [{transform_indices = @transform_0, window_bounds = array<i64: 256, 256>}, {pipeline_mode = #tpu.pipeline_mode<synchronous>, transform_indices = @transform_1, window_bounds = array<i64: 256, 128>}, {pipeline_mode = #tpu.pipeline_mode<synchronous>, transform_indices = @transform_2, window_bounds = array<i64: 1, 128>}, {pipeline_mode = #tpu.pipeline_mode<synchronous>, transform_indices = @transform_3, window_bounds = array<i64: 1, 128>}, {transform_indices = @transform_4, window_bounds = array<i64: 256, 128>}]} {
    %c0 = arith.constant 0 : index
    %c0_0 = arith.constant 0 : index
    %0 = vector.load %arg1[%c0, %c0_0] : memref<256x256xbf16, #tpu.memory_space<vmem>>, vector<256x256xbf16>
    %c0_1 = arith.constant 0 : index
    %c0_2 = arith.constant 0 : index
    %1 = vector.load %arg2[%c0_1, %c0_2] : memref<256x128xbf16, #tpu.memory_space<vmem>>, vector<256x128xbf16>
    %cst = arith.constant dense<0.000000e+00> : vector<256x128xf32>
    %2 = tpu.matmul %0, %1, %cst {dimension_numbers = #tpu.dot_dimension_numbers<[1], [0], [0], [1], [0, 0, 1, 1], [], []>} : vector<256x256xbf16>, vector<256x128xbf16>, vector<256x128xf32> -> vector<256x128xf32>
    %c0_3 = arith.constant 0 : index
    %c0_4 = arith.constant 0 : index
    %3 = vector.load %arg3[%c0_3, %c0_4] : memref<1x128xf32, #tpu.memory_space<vmem>>, vector<1x128xf32>
    %4 = vector.broadcast %3 : vector<1x128xf32> to vector<256x128xf32>
    %5 = arith.mulf %2, %4 : vector<256x128xf32>
    %c0_5 = arith.constant 0 : index
    %c0_6 = arith.constant 0 : index
    %6 = vector.load %arg4[%c0_5, %c0_6] : memref<1x128xf32, #tpu.memory_space<vmem>>, vector<1x128xf32>
    %7 = vector.broadcast %6 : vector<1x128xf32> to vector<256x128xf32>
    %8 = arith.addf %5, %7 : vector<256x128xf32>
    %cst_7 = arith.constant 0.000000e+00 : f32
    %9 = vector.broadcast %cst_7 : f32 to vector<256x128xf32>
    %10 = arith.maximumf %8, %9 : vector<256x128xf32>
    %c0_8 = arith.constant 0 : index
    %c0_9 = arith.constant 0 : index
    %11 = vector.load %arg5[%c0_8, %c0_9] : memref<256x128xf32, #tpu.memory_space<vmem>>, vector<256x128xf32>
    tpu.vector_store %arg5[%c0_8, %c0_9], %10 {strides = array<i32>} : memref<256x128xf32, #tpu.memory_space<vmem>>, vector<256x128xf32>,
    return
  }
  func.func @transform_0(%arg0: i32) -> (i32, i32) {
    %c0_i32 = arith.constant 0 : i32
    %c0_i32_0 = arith.constant 0 : i32
    return %arg0, %c0_i32 : i32, i32
  }
  func.func @transform_1(%arg0: i32) -> (i32, i32) {
    %c0_i32 = arith.constant 0 : i32
    %c0_i32_0 = arith.constant 0 : i32
    %c0_i32_1 = arith.constant 0 : i32
    return %c0_i32, %c0_i32_0 : i32, i32
  }
  func.func @transform_2(%arg0: i32) -> (i32, i32) {
    %c0_i32 = arith.constant 0 : i32
    %c0_i32_0 = arith.constant 0 : i32
    %c0_i32_1 = arith.constant 0 : i32
    return %c0_i32, %c0_i32_0 : i32, i32
  }
  func.func @transform_3(%arg0: i32) -> (i32, i32) {
    %c0_i32 = arith.constant 0 : i32
    %c0_i32_0 = arith.constant 0 : i32
    %c0_i32_1 = arith.constant 0 : i32
    return %c0_i32, %c0_i32_0 : i32, i32
  }
  func.func @transform_4(%arg0: i32) -> (i32, i32) {
    %c0_i32 = arith.constant 0 : i32
    %c0_i32_0 = arith.constant 0 : i32
    return %arg0, %c0_i32 : i32, i32
  }
}

module attributes {stable_mosaic.version = 11 : i64} {
  func.func @_maxpool_3x3_s2_kernel(%arg0: i32, %arg1: memref<1x7x2x14x128xf32, #tpu.memory_space<vmem>>, %arg2: memref<1x7x14x128xf32, #tpu.memory_space<vmem>>, %arg3: memref<1x7x16x128xf32, #tpu.memory_space<vmem>>) attributes {dimension_semantics = [#tpu.dimension_semantics<parallel>], iteration_bounds = array<i64: 2>, scalar_prefetch = 0 : i64, scratch_operands = 1 : i64, tpu.core_type = #tpu.core_type<tc>, window_params = [{transform_indices = @transform_0, window_bounds = array<i64: 1, 7, 2, 14, 128>}, {transform_indices = @transform_1, window_bounds = array<i64: 1, 7, 14, 128>}]} {
    %c0 = arith.constant 0 : index
    %c0_0 = arith.constant 0 : index
    %c0_1 = arith.constant 0 : index
    %c0_2 = arith.constant 0 : index
    %c0_3 = arith.constant 0 : index
    %0 = vector.load %arg1[%c0, %c0_0, %c0_1, %c0_2, %c0_3] : memref<1x7x2x14x128xf32, #tpu.memory_space<vmem>>, vector<1x7x1x14x128xf32>
    %1 = vector.shape_cast %0 : vector<1x7x1x14x128xf32> to vector<1x7x14x128xf32>
    %c0_4 = arith.constant 0 : index
    %c0_5 = arith.constant 0 : index
    %c1 = arith.constant 1 : index
    %c0_6 = arith.constant 0 : index
    %c0_7 = arith.constant 0 : index
    %2 = vector.load %arg1[%c0_4, %c0_5, %c1, %c0_6, %c0_7] : memref<1x7x2x14x128xf32, #tpu.memory_space<vmem>>, vector<1x7x1x14x128xf32>
    %3 = vector.shape_cast %2 : vector<1x7x1x14x128xf32> to vector<1x7x14x128xf32>
    %4 = arith.maximumf %1, %3 : vector<1x7x14x128xf32>
    %cst = arith.constant 0.000000e+00 : f32
    %5 = vector.broadcast %cst : f32 to vector<1x7x16x128xf32>
    %c0_8 = arith.constant 0 : index
    %c0_9 = arith.constant 0 : index
    %c0_10 = arith.constant 0 : index
    %c0_11 = arith.constant 0 : index
    %6 = vector.load %arg3[%c0_8, %c0_9, %c0_10, %c0_11] : memref<1x7x16x128xf32, #tpu.memory_space<vmem>>, vector<1x7x16x128xf32>
    tpu.vector_store %arg3[%c0_8, %c0_9, %c0_10, %c0_11], %5 {strides = array<i32>} : memref<1x7x16x128xf32, #tpu.memory_space<vmem>>, vector<1x7x16x128xf32>,
    %7 = vector.extract_strided_slice %4 {offsets = [0, 0, 0, 0], sizes = [1, 1, 14, 128], strides = [1, 1, 1, 1]} : vector<1x7x14x128xf32> to vector<1x1x14x128xf32>
    %c0_12 = arith.constant 0 : index
    %c0_13 = arith.constant 0 : index
    %c1_14 = arith.constant 1 : index
    %c0_15 = arith.constant 0 : index
    %8 = vector.load %arg3[%c0_12, %c0_13, %c1_14, %c0_15] : memref<1x7x16x128xf32, #tpu.memory_space<vmem>>, vector<1x1x14x128xf32>
    tpu.vector_store %arg3[%c0_12, %c0_13, %c1_14, %c0_15], %7 {strides = array<i32>} : memref<1x7x16x128xf32, #tpu.memory_space<vmem>>, vector<1x1x14x128xf32>,
    %9 = vector.extract_strided_slice %4 {offsets = [0, 1, 0, 0], sizes = [1, 6, 14, 128], strides = [1, 1, 1, 1]} : vector<1x7x14x128xf32> to vector<1x6x14x128xf32>
    %10 = vector.extract_strided_slice %3 {offsets = [0, 0, 0, 0], sizes = [1, 6, 14, 128], strides = [1, 1, 1, 1]} : vector<1x7x14x128xf32> to vector<1x6x14x128xf32>
    %11 = arith.maximumf %9, %10 : vector<1x6x14x128xf32>
    %c0_16 = arith.constant 0 : index
    %c1_17 = arith.constant 1 : index
    %c1_18 = arith.constant 1 : index
    %c0_19 = arith.constant 0 : index
    %12 = vector.load %arg3[%c0_16, %c1_17, %c1_18, %c0_19] : memref<1x7x16x128xf32, #tpu.memory_space<vmem>>, vector<1x6x14x128xf32>
    tpu.vector_store %arg3[%c0_16, %c1_17, %c1_18, %c0_19], %11 {strides = array<i32>} : memref<1x7x16x128xf32, #tpu.memory_space<vmem>>, vector<1x6x14x128xf32>,
    %c0_20 = arith.constant 0 : index
    %c0_21 = arith.constant 0 : index
    %c0_22 = arith.constant 0 : index
    %c0_23 = arith.constant 0 : index
    %13 = vector.load %arg3[%c0_20, %c0_21, %c0_22, %c0_23] : memref<1x7x16x128xf32, #tpu.memory_space<vmem>>, vector<1x7x14x128xf32>
    %c0_24 = arith.constant 0 : index
    %c0_25 = arith.constant 0 : index
    %c1_26 = arith.constant 1 : index
    %c0_27 = arith.constant 0 : index
    %14 = vector.load %arg3[%c0_24, %c0_25, %c1_26, %c0_27] : memref<1x7x16x128xf32, #tpu.memory_space<vmem>>, vector<1x7x14x128xf32>
    %c0_28 = arith.constant 0 : index
    %c0_29 = arith.constant 0 : index
    %c2 = arith.constant 2 : index
    %c0_30 = arith.constant 0 : index
    %15 = vector.load %arg3[%c0_28, %c0_29, %c2, %c0_30] : memref<1x7x16x128xf32, #tpu.memory_space<vmem>>, vector<1x7x14x128xf32>
    %16 = arith.maximumf %13, %14 : vector<1x7x14x128xf32>
    %17 = arith.maximumf %16, %15 : vector<1x7x14x128xf32>
    %c0_31 = arith.constant 0 : index
    %c0_32 = arith.constant 0 : index
    %c0_33 = arith.constant 0 : index
    %c0_34 = arith.constant 0 : index
    %18 = vector.load %arg2[%c0_31, %c0_32, %c0_33, %c0_34] : memref<1x7x14x128xf32, #tpu.memory_space<vmem>>, vector<1x7x14x128xf32>
    tpu.vector_store %arg2[%c0_31, %c0_32, %c0_33, %c0_34], %17 {strides = array<i32>} : memref<1x7x14x128xf32, #tpu.memory_space<vmem>>, vector<1x7x14x128xf32>,
    return
  }
  func.func @transform_0(%arg0: i32) -> (i32, i32, i32, i32, i32) {
    %c0_i32 = arith.constant 0 : i32
    %c0_i32_0 = arith.constant 0 : i32
    %c0_i32_1 = arith.constant 0 : i32
    %c0_i32_2 = arith.constant 0 : i32
    %c0_i32_3 = arith.constant 0 : i32
    return %arg0, %c0_i32, %c0_i32_0, %c0_i32_1, %c0_i32_2 : i32, i32, i32, i32, i32
  }
  func.func @transform_1(%arg0: i32) -> (i32, i32, i32, i32) {
    %c0_i32 = arith.constant 0 : i32
    %c0_i32_0 = arith.constant 0 : i32
    %c0_i32_1 = arith.constant 0 : i32
    %c0_i32_2 = arith.constant 0 : i32
    return %arg0, %c0_i32, %c0_i32_0, %c0_i32_1 : i32, i32, i32, i32
  }
}

</mosaic_0001>

<bundles_post_ra>
// kernel: image_encoder_forward.3
= control target key start
LH: loop header
LB: loop body
LE: loop exit
PB: predicated region body
PF: predicated region fallthrough
CT: control target
= control target key end

     0   :  { %s393_s6 = smov 0   ;;  %s494_s0 = inlined_call_operand.vmem [shape: f32[2,7,2,14,128], index: 0, kind: input, shape index: {}]   ;;  %s495_s1 = inlined_call_operand.vmem [shape: f32[2,7,14,128], index: 1, kind: output, shape index: {}]  }
   0x1 LB: > { %s340_s7 = sadd.s32 4294967295, %s380_s6   ;;  %p344_p0 = scmp.ge.s32.totalorder %s380_s6, 1  ;;  %s380_s6 = sphi %s393_s6, %s11_s6  }
   0x2   : > { %p87_p1 = scmp.lt.s32.totalorder %s380_s6, 3 }
   0x4   : > { %p88_p2 = pnand %p344_p0, %p87_p1 }
   0x5   : > { %p401_p3 = scmp.lt.s32.totalorder (!%p88_p2), %s340_s7, 1 }
   0x6   : > { %91 = sbr.rel (%p88_p2) target bundleno = 47 (0x2f), region = 24 }
   0xb   : > { %v382_v0 = vmov 0.0   ;;  %s498_s7 = smov (!%p401_p3, %s340_s7), 1 }
   0xc   : > { %160 = vst [vmem:[#allocation2] sm:$0xff] %v382_v0  ;;  %161 = vst [vmem:[#allocation2 + $0x8] sm:$0xff] %v382_v0  ;;  %s363_s9 = smul.u32 224, %s498_s7 }
   0xd   : > { %162 = vst [vmem:[#allocation2 + $0x10] sm:$0xff] %v382_v0  ;;  %163 = vst [vmem:[#allocation2 + $0x18] sm:$0xff] %v382_v0  ;;  %s364_s13 = smul.u32 112, %s498_s7 }
   0xe   : > { %164 = vst [vmem:[#allocation2 + $0x20] sm:$0xff] %v382_v0  ;;  %165 = vst [vmem:[#allocation2 + $0x28] sm:$0xff] %v382_v0  ;;  %s413_s12 = scalar_lea.vmem %s494_s0, %s363_s9 }
   0xf   : > { %166 = vst [vmem:[#allocation2 + $0x30] sm:$0xff] %v382_v0  ;;  %167 = vst [vmem:[#allocation2 + $0x38] sm:$0xff] %v382_v0  ;;  %v117_v1 = vld [vmem:[%s413_s12] sm:$0xff]  ;;  %v347_v2 = vld [vmem:[%s413_s12 + $0x10] sm:$0xff]  ;;  %s468_s16 = scalar_lea.vmem %s495_s1, %s364_s13 }
  0x10   : > { %168 = vst [vmem:[#allocation2 + $0x40] sm:$0xff] %v382_v0  ;;  %169 = vst [vmem:[#allocation2 + $0x48] sm:$0xff] %v382_v0  ;;  %v118_v3 = vld [vmem:[%s413_s12 + $0x8] sm:$0x3f]  ;;  %v418_v4 = vmax.f32 %v117_v1, %v347_v2  ;;  %v348_v5 = vld [vmem:[%s413_s12 + $0x18] sm:$0x3f] }
  0x11   : > { %170 = vst [vmem:[#allocation2 + $0x50] sm:$0xff] %v382_v0  ;;  %171 = vst [vmem:[#allocation2 + $0x58] sm:$0xff] %v382_v0  ;;  %v119_v6 = vld [vmem:[%s413_s12 + $0x20] sm:$0xff]  ;;  %v349_v7 = vld [vmem:[%s413_s12 + $0x30] sm:$0xff]  ;;  %v147_v8 = vmax.f32 %v118_v3, %v348_v5 }
  0x12   : > { %172 = vst [vmem:[#allocation2 + $0x60] sm:$0xff] %v382_v0  ;;  %173 = vst [vmem:[#allocation2 + $0x68] sm:$0xff] %v382_v0  ;;  %v148_v9 = vmax.f32 %v119_v6, %v349_v7  ;;  %v120_v10 = vld [vmem:[%s413_s12 + $0x28] sm:$0x3f]  ;;  %v350_v11 = vld [vmem:[%s413_s12 + $0x38] sm:$0x3f] }
  0x13   : > { %v121_v12 = vld [vmem:[%s413_s12 + $0x40] sm:$0xff]  ;;  %174 = vst [vmem:[#allocation2 + $0x1] sm:$0xff] %v418_v4  ;;  %v149_v13 = vmax.f32 %v120_v10, %v350_v11  ;;  %v351_v14 = vld [vmem:[%s413_s12 + $0x50] sm:$0xff]  ;;  %v122_v15 = vld [vmem:[%s413_s12 + $0x48] sm:$0x3f] }
  0x14   : > { %v352_v16 = vld [vmem:[%s413_s12 + $0x58] sm:$0x3f]  ;;  %175 = vst [vmem:[#allocation2 + $0x9] sm:$0x3f] %v147_v8  ;;  %v430_v17 = vmax.f32 %v148_v9, %v347_v2  ;;  %v150_v18 = vmax.f32 %v121_v12, %v351_v14  ;;  %v123_v20 = vld [vmem:[%s413_s12 + $0x60] sm:$0xff]  ;;  %v353_v21 = vld [vmem:[%s413_s12 + $0x70] sm:$0xff] }
  0x15   : > { %v151_v19 = vmax.f32 %v122_v15, %v352_v16  ;;  %v124_v22 = vld [vmem:[%s413_s12 + $0x68] sm:$0x3f]  ;;  %v177_v23 = vmax.f32 %v149_v13, %v348_v5  ;;  %v152_v24 = vmax.f32 %v123_v20, %v353_v21  ;;  %v354_v25 = vld [vmem:[%s413_s12 + $0x78] sm:$0x3f]  ;;  %v125_v26 = vld [vmem:[%s413_s12 + $0x80] sm:$0xff] }
  0x16   : > { %v355_v27 = vld [vmem:[%s413_s12 + $0x90] sm:$0xff]  ;;  %189 = vst [vmem:[#allocation2 + $0x11] sm:$0xff] %v430_v17  ;;  %v439_v28 = vmax.f32 %v150_v18, %v349_v7  ;;  %v153_v30 = vmax.f32 %v124_v22, %v354_v25  ;;  %v126_v32 = vld [vmem:[%s413_s12 + $0x88] sm:$0x3f]  ;;  %v356_v33 = vld [vmem:[%s413_s12 + $0x98] sm:$0x3f] }
  0x17   : > { %v179_v29 = vmax.f32 %v151_v19, %v350_v11  ;;  %v154_v31 = vmax.f32 %v125_v26, %v355_v27  ;;  %v127_v34 = vld [vmem:[%s413_s12 + $0xa0] sm:$0xff]  ;;  %190 = vst [vmem:[#allocation2 + $0x19] sm:$0x3f] %v177_v23  ;;  %v444_v35 = vmax.f32 %v152_v24, %v351_v14  ;;  %v155_v36 = vmax.f32 %v126_v32, %v356_v33  ;;  %v357_v37 = vld [vmem:[%s413_s12 + $0xb0] sm:$0xff]  ;;  %v128_v38 = vld [vmem:[%s413_s12 + $0xa8] sm:$0x3f] }
  0x18   : > { %v358_v39 = vld [vmem:[%s413_s12 + $0xb8] sm:$0x3f]  ;;  %191 = vst [vmem:[#allocation2 + $0x21] sm:$0xff] %v439_v28  ;;  %v181_v40 = vmax.f32 %v153_v30, %v352_v16  ;;  %v156_v42 = vmax.f32 %v127_v34, %v357_v37  ;;  %v129_v44 = vld [vmem:[%s413_s12 + $0xc0] sm:$0xff]  ;;  %v359_v45 = vld [vmem:[%s413_s12 + $0xd0] sm:$0xff] }
  0x19   : > { %192 = vst [vmem:[#allocation2 + $0x29] sm:$0x3f] %v179_v29  ;;  %v450_v41 = vmax.f32 %v154_v31, %v353_v21  ;;  %v157_v43 = vmax.f32 %v128_v38, %v358_v39  ;;  %v130_v46 = vld [vmem:[%s413_s12 + $0xc8] sm:$0x3f]  ;;  %193 = vst [vmem:[#allocation2 + $0x31] sm:$0xff] %v444_v35  ;;  %v183_v47 = vmax.f32 %v155_v36, %v354_v25 }
  0x1a   : > { %v158_v48 = vmax.f32 %v129_v44, %v359_v45  ;;  %v360_v49 = vld [vmem:[%s413_s12 + $0xd8] sm:$0x3f]  ;;  %194 = vst [vmem:[#allocation2 + $0x39] sm:$0x3f] %v181_v40  ;;  %v459_v50 = vmax.f32 %v156_v42, %v355_v27  ;;  %v201_v53 = vld [vmem:[#allocation2] sm:$0xff] }
  0x1b   : > { %195 = vst [vmem:[#allocation2 + $0x41] sm:$0xff] %v450_v41  ;;  %v185_v51 = vmax.f32 %v157_v43, %v356_v33  ;;  %v159_v52 = vmax.f32 %v130_v46, %v360_v49  ;;  %196 = vst [vmem:[#allocation2 + $0x49] sm:$0x3f] %v183_v47  ;;  %v229_v55 = vld [vmem:[#allocation2 + $0x2] sm:$0xff]  ;;  %v243_v56 = vmax.f32 %v201_v53, %v418_v4  ;;  %v230_v60 = vld [vmem:[#allocation2 + $0xa] sm:$0x3f] }
  0x1c   : > { %v461_v54 = vmax.f32 %v158_v48, %v357_v37  ;;  %v202_v57 = vld [vmem:[#allocation2 + $0x8] sm:$0x3f]  ;;  %197 = vst [vmem:[#allocation2 + $0x51] sm:$0xff] %v459_v50 }
  0x1d   : > { %v216_v58 = vld [vmem:[#allocation2 + $0x9] sm:$0x3f]  ;;  %198 = vst [vmem:[#allocation2 + $0x59] sm:$0x3f] %v185_v51  ;;  %v187_v59 = vmax.f32 %v159_v52, %v358_v39  ;;  %v257_v62 = vmax.f32 %v243_v56, %v229_v55  ;;  %v203_v63 = vld [vmem:[#allocation2 + $0x10] sm:$0xff] }
  0x1e   : > { %v244_v61 = vmax.f32 %v202_v57, %v216_v58  ;;  %199 = vst [vmem:[#allocation2 + $0x61] sm:$0xff] %v461_v54  ;;  %v245_v1 = vmax.f32 %v203_v63, %v430_v17  ;;  %v204_v2 = vld [vmem:[#allocation2 + $0x18] sm:$0x3f] }
  0x1f   : > { %200 = vst [vmem:[#allocation2 + $0x69] sm:$0x3f] %v187_v59  ;;  %v218_v3 = vld [vmem:[#allocation2 + $0x19] sm:$0x3f]  ;;  %271 = vst [vmem:[%s468_s16] sm:$0xff] %v257_v62  ;;  %v205_v6 = vld [vmem:[#allocation2 + $0x20] sm:$0xff] }
  0x20   : > { %v258_v0 = vmax.f32 %v244_v61, %v230_v60  ;;  %v231_v4 = vld [vmem:[#allocation2 + $0x12] sm:$0xff]  ;;  %v246_v5 = vmax.f32 %v204_v2, %v218_v3  ;;  %v232_v8 = vld [vmem:[#allocation2 + $0x1a] sm:$0x3f]  ;;  %v247_v9 = vmax.f32 %v205_v6, %v439_v28  ;;  %v206_v10 = vld [vmem:[#allocation2 + $0x28] sm:$0x3f] }
  0x21   : > { %v259_v7 = vmax.f32 %v245_v1, %v231_v4  ;;  %v220_v11 = vld [vmem:[#allocation2 + $0x29] sm:$0x3f]  ;;  %v207_v15 = vld [vmem:[#allocation2 + $0x30] sm:$0xff]  ;;  %v208_v16 = vld [vmem:[#allocation2 + $0x38] sm:$0x3f] }
  0x22   : > { %272 = vst [vmem:[%s468_s16 + $0x8] sm:$0x3f] %v258_v0  ;;  %v260_v12 = vmax.f32 %v246_v5, %v232_v8  ;;  %v233_v13 = vld [vmem:[#allocation2 + $0x22] sm:$0xff]  ;;  %v248_v14 = vmax.f32 %v206_v10, %v220_v11  ;;  %v234_v18 = vld [vmem:[#allocation2 + $0x2a] sm:$0x3f]  ;;  %v249_v19 = vmax.f32 %v207_v15, %v444_v35  ;;  %v235_v23 = vld [vmem:[#allocation2 + $0x32] sm:$0xff] }
  0x23   : > { %273 = vst [vmem:[%s468_s16 + $0x10] sm:$0xff] %v259_v7  ;;  %v261_v17 = vmax.f32 %v247_v9, %v233_v13  ;;  %v222_v20 = vld [vmem:[#allocation2 + $0x39] sm:$0x3f]  ;;  %v209_v21 = vld [vmem:[#allocation2 + $0x40] sm:$0xff]  ;;  %v210_v26 = vld [vmem:[#allocation2 + $0x48] sm:$0x3f] }
  0x24   : > { %274 = vst [vmem:[%s468_s16 + $0x18] sm:$0x3f] %v260_v12  ;;  %v262_v22 = vmax.f32 %v248_v14, %v234_v18  ;;  %v250_v24 = vmax.f32 %v208_v16, %v222_v20  ;;  %v251_v25 = vmax.f32 %v209_v21, %v450_v41  ;;  %v224_v27 = vld [vmem:[#allocation2 + $0x49] sm:$0x3f]  ;;  %v263_v28 = vmax.f32 %v249_v19, %v235_v23  ;;  %v236_v29 = vld [vmem:[#allocation2 + $0x3a] sm:$0x3f] }
  0x25   : > { %275 = vst [vmem:[%s468_s16 + $0x20] sm:$0xff] %v261_v17  ;;  %v237_v30 = vld [vmem:[#allocation2 + $0x42] sm:$0xff]  ;;  %v252_v31 = vmax.f32 %v210_v26, %v224_v27  ;;  %v211_v32 = vld [vmem:[#allocation2 + $0x50] sm:$0xff]  ;;  %v238_v35 = vld [vmem:[#allocation2 + $0x4a] sm:$0x3f] }
  0x26   : > { %276 = vst [vmem:[%s468_s16 + $0x28] sm:$0x3f] %v262_v22  ;;  %v264_v33 = vmax.f32 %v250_v24, %v236_v29  ;;  %v265_v34 = vmax.f32 %v251_v25, %v237_v30  ;;  %v253_v36 = vmax.f32 %v211_v32, %v459_v50  ;;  %v212_v37 = vld [vmem:[#allocation2 + $0x58] sm:$0x3f]  ;;  %277 = vst [vmem:[%s468_s16 + $0x30] sm:$0xff] %v263_v28  ;;  %v213_v42 = vld [vmem:[#allocation2 + $0x60] sm:$0xff] }
  0x27   : > { %v226_v38 = vld [vmem:[#allocation2 + $0x59] sm:$0x3f]  ;;  %v266_v39 = vmax.f32 %v252_v31, %v238_v35  ;;  %v214_v43 = vld [vmem:[#allocation2 + $0x68] sm:$0x3f]  ;;  %v255_v46 = vmax.f32 %v213_v42, %v461_v54 }
  0x28   : > { %v239_v40 = vld [vmem:[#allocation2 + $0x52] sm:$0xff]  ;;  %v254_v41 = vmax.f32 %v212_v37, %v226_v38  ;;  %278 = vst [vmem:[%s468_s16 + $0x38] sm:$0x3f] %v264_v33  ;;  %279 = vst [vmem:[%s468_s16 + $0x40] sm:$0xff] %v265_v34  ;;  %v240_v45 = vld [vmem:[#allocation2 + $0x5a] sm:$0x3f] }
  0x29   : > { %v267_v44 = vmax.f32 %v253_v36, %v239_v40  ;;  %v228_v47 = vld [vmem:[#allocation2 + $0x69] sm:$0x3f]  ;;  %280 = vst [vmem:[%s468_s16 + $0x48] sm:$0x3f] %v266_v39 }
  0x2a   : > { %v268_v48 = vmax.f32 %v254_v41, %v240_v45  ;;  %v241_v49 = vld [vmem:[#allocation2 + $0x62] sm:$0xff]  ;;  %v256_v50 = vmax.f32 %v214_v43, %v228_v47  ;;  %v242_v52 = vld [vmem:[#allocation2 + $0x6a] sm:$0x3f] }
  0x2b   : > { %281 = vst [vmem:[%s468_s16 + $0x50] sm:$0xff] %v267_v44  ;;  %v269_v51 = vmax.f32 %v255_v46, %v241_v49 }
  0x2c   : > { %282 = vst [vmem:[%s468_s16 + $0x58] sm:$0x3f] %v268_v48  ;;  %v270_v53 = vmax.f32 %v256_v50, %v242_v52 }
  0x2d   : > { %283 = vst [vmem:[%s468_s16 + $0x60] sm:$0xff] %v269_v51 }
  0x2e   : > { %284 = vst [vmem:[%s468_s16 + $0x68] sm:$0x3f] %v270_v53 }
  0x2f PF: > { %s11_s6 = sadd.s32 1, %s380_s6  }
  0x30   : > { %p8_p4 = scmp.ge.s32.totalorder %s11_s6, 4  }
  0x32   :  { %10 = sbr.rel (!%p8_p4) target bundleno = 1 (0x1), region = 56 }

// kernel: image_encoder_forward.2
= control target key start
LH: loop header
LB: loop body
LE: loop exit
PB: predicated region body
PF: predicated region fallthrough
CT: control target
= control target key end

     0   :  { %s1663_s15 = smov 0   ;;  %s1665_s16 = smov 0   ;;  %s2030_s0 = inlined_call_operand.vmem [shape: bf16[392,256], index: 0, kind: input, shape index: {}]   ;;  %s2031_s1 = inlined_call_operand.vmem [shape: bf16[256,128], index: 1, kind: input, shape index: {}]   ;;  %s2032_s2 = inlined_call_operand.vmem [shape: f32[1,128], index: 2, kind: input, shape index: {}]   ;;  %s2033_s3 = inlined_call_operand.vmem [shape: f32[1,128], index: 3, kind: input, shape index: {}]   ;;  %s2034_s4 = inlined_call_operand.vmem [shape: f32[392,128], index: 4, kind: output, shape index: {}]  }
   0x1   :  { %s1667_s17 = smov 0  }
   0x2 LB: > { %s1676_s18 = sadd.s32 4294967295, %s1604_s17   ;;  %s1678_s19 = sadd.s32 1, %s1604_s17   ;;  %s1604_s17 = sphi %s1667_s17, %s2043_s17   ;;  %s1600_s16 = sphi %s1665_s16, %s2042_s16   ;;  %s1596_s15 = sphi %s1663_s15, %s2041_s15  }
   0x3   : > { %s107_s20 = ssub.s32 %s1604_s17, %s1678_s19  ;;  %s110_s21 = sadd.s32 1, %s1600_s16 }
   0x4   : > { %p108_p0 = scmp.eq.s32.totalorder %s107_s20, 0  ;;  %p120_p1 = scmp.ne.s32.totalorder %s1600_s16, %s1596_s15 }
   0x5   : > { %p121_p2 = scmp.eq.s32.totalorder %s1676_s18, 1  ;;  %p1194_p3 = scmp.ge.s32.totalorder %s1604_s17, 1 }
   0x6   : > { %s1686_s22 = scalar_select %p108_p0, %s1600_s16, %s110_s21  }
   0x7   : > { %p1688_p4 = por %p121_p2, %p120_p1  ;;  %p174_p5 = scmp.lt.s32.totalorder %s1604_s17, 3 }
   0x9   : > { %p175_p6 = pnand %p1194_p3, %p174_p5 }
   0xa   : > { %s1696_s26 = sshll.u32 (!%p175_p6), %s1676_s18, 5  ;;  %s202_s21 = sand.u32 (!%p175_p6), 1, %s1596_s15  }
   0xb   : > { %178 = sbr.rel (%p175_p6) target bundleno = 361 (0x169), region = 36  ;;  %p211_p7 = scmp.lt.s32.totalorder (!%p175_p6), %s1696_s26, 48 }
  0x10   : > { %v1486_v0 = vld [vmem:[%s2031_s1 + $0x78] sm:$0xff]   ;;  %v1488_v2 = vld [vmem:[%s2031_s1 + $0x70] sm:$0xff]   ;;  %v1490_v4 = vld [vmem:[%s2031_s1 + $0x68] sm:$0xff]   ;;  %s212_s11 = scalar_select %p211_p7, %s1696_s26, 48 }
  0x11   : > { %v1487_v1 = vld [vmem:[%s2031_s1 + $0x38] sm:$0xff]   ;;  %1270 = vmatprep.subr.bf16.mxu0 %v1486_v0  ;;  %1382 = vmatprep.subr.bf16.mxu1 %v1486_v0  ;;  %v1489_v3 = vld [vmem:[%s2031_s1 + $0x30] sm:$0xff]   ;;  %v1491_v5 = vld [vmem:[%s2031_s1 + $0x28] sm:$0xff]   ;;  %s859_s30 = ssub.s32 (%p1688_p4), 49, %s1696_s26  ;;  %s1267_s5 = sshll.u32 (%p1688_p4), %s1676_s18, 8 }
  0x12   : > { %1271 = vmatpush3.bf16.msra.mxu0 %v1487_v1  ;;  %1390 = vmatpush3.bf16.msra.mxu1 %v1487_v1  ;;  %v1492_v6 = vld [vmem:[%s2031_s1 + $0x60] sm:$0xff]   ;;  %s1266_s20 = sshll.u32 %s212_s11, 3  ;;  %v1494_v8 = vld [vmem:[%s2031_s1 + $0x58] sm:$0xff]   ;;  %v1496_v10 = vld [vmem:[%s2031_s1 + $0x50] sm:$0xff]   ;;  %p860_p8 = scmp.lt.s32.totalorder (%p1688_p4), %s859_s30, 32 }
  0x13   : > { %1272 = vmatprep.subr.bf16.mxu0 %v1488_v2  ;;  %1383 = vmatprep.subr.bf16.mxu1 %v1488_v2  ;;  %v1493_v7 = vld [vmem:[%s2031_s1 + $0x20] sm:$0xff]   ;;  %s1727_s28 = scalar_lea.vmem %s2030_s0, %s1266_s20  ;;  %v1495_v9 = vld [vmem:[%s2031_s1 + $0x18] sm:$0xff]   ;;  %v1497_v13 = vld [vmem:[%s2031_s1 + $0x10] sm:$0xff]   ;;  %s1898_s8 = scalar_lea.vmem (%p1688_p4), %s2034_s4, %s1267_s5  }
  0x14   : > { %v1504_v11 = vld [vmem:[%s1727_s28 + $0x4] ss:$8 sps:$4 sm:$0xff]   ;;  %v1502_v18 = vld [vmem:[%s1727_s28] ss:$8 sps:$4 sm:$0xff]   ;;  %v1508_v20 = vld [vmem:[%s1727_s28 + $0x14] ss:$8 sps:$4 sm:$0xff]  }
  0x15   : > { %v1507_v12 = vld [vmem:[%s1727_s28 + $0x84] ss:$8 sps:$4 sm:$0xff]   ;;  %580 = vmatprep.mubr.bf16.mxu0 %v1504_v11  ;;  %v1505_v19 = vld [vmem:[%s1727_s28 + $0x80] ss:$8 sps:$4 sm:$0xff]   ;;  %v1510_v21 = vld [vmem:[%s1727_s28 + $0x94] ss:$8 sps:$4 sm:$0xff]  }
  0x16   : > { %1273 = vmatpush3.bf16.msra.mxu0 %v1489_v3  ;;  %1391 = vmatpush3.bf16.msra.mxu1 %v1489_v3  ;;  %v1498_v14 = vld [vmem:[%s2031_s1 + $0x48] sm:$0xff]   ;;  %v1500_v16 = vld [vmem:[%s2031_s1 + $0x40] sm:$0xff]   ;;  %v1512_v22 = vld [vmem:[%s1727_s28 + $0x10] ss:$8 sps:$4 sm:$0xff]  }
  0x17   : > { %1274 = vmatprep.subr.bf16.mxu0 %v1490_v4  ;;  %1384 = vmatprep.subr.bf16.mxu1 %v1490_v4  ;;  %v1499_v15 = vld [vmem:[%s2031_s1 + $0x8] sm:$0xff]   ;;  %v1501_v17 = vld [vmem:[%s2031_s1] sm:$0xff]   ;;  %v1513_v23 = vld [vmem:[%s1727_s28 + $0x90] ss:$8 sps:$4 sm:$0xff]  }
  0x18   : > { %644 = vmatprep.mubr.bf16.mxu1 %v1507_v12  ;;  %v1514_v24 = vld [vmem:[%s1727_s28 + $0x24] ss:$8 sps:$4 sm:$0xff]   ;;  %v1518_v26 = vld [vmem:[%s1727_s28 + $0x20] ss:$8 sps:$4 sm:$0xff]   ;;  %v1520_v28 = vld [vmem:[%s1727_s28 + $0x34] ss:$8 sps:$4 sm:$0xff]  }
  0x19   : > { %v1516_v25 = vld [vmem:[%s1727_s28 + $0xa4] ss:$8 sps:$4 sm:$0xff]   ;;  %v1519_v27 = vld [vmem:[%s1727_s28 + $0xa0] ss:$8 sps:$4 sm:$0xff]   ;;  %v1522_v29 = vld [vmem:[%s1727_s28 + $0xb4] ss:$8 sps:$4 sm:$0xff]  }
  0x1a   : > { %1275 = vmatpush3.bf16.msra.mxu0 %v1491_v5  ;;  %1392 = vmatpush3.bf16.msra.mxu1 %v1491_v5  ;;  %v1524_v30 = vld [vmem:[%s1727_s28 + $0x30] ss:$8 sps:$4 sm:$0xff]   ;;  %v1526_v32 = vld [vmem:[%s1727_s28 + $0x44] ss:$8 sps:$4 sm:$0xff]   ;;  %v1530_v34 = vld [vmem:[%s1727_s28 + $0x40] ss:$8 sps:$4 sm:$0xff]  }
  0x1b   : > { %1276 = vmatprep.subr.bf16.mxu0 %v1492_v6  ;;  %1385 = vmatprep.subr.bf16.mxu1 %v1492_v6  ;;  %v1525_v31 = vld [vmem:[%s1727_s28 + $0xb0] ss:$8 sps:$4 sm:$0xff]   ;;  %v1528_v33 = vld [vmem:[%s1727_s28 + $0xc4] ss:$8 sps:$4 sm:$0xff]   ;;  %v1531_v35 = vld [vmem:[%s1727_s28 + $0xc0] ss:$8 sps:$4 sm:$0xff]  }
  0x1c   : > { %v1532_v36 = vld [vmem:[%s1727_s28 + $0x54] ss:$8 sps:$4 sm:$0xff]   ;;  %v1536_v38 = vld [vmem:[%s1727_s28 + $0x50] ss:$8 sps:$4 sm:$0xff]   ;;  %v1538_v40 = vld [vmem:[%s1727_s28 + $0x64] ss:$8 sps:$4 sm:$0xff]  }
  0x1d   : > { %v1534_v37 = vld [vmem:[%s1727_s28 + $0xd4] ss:$8 sps:$4 sm:$0xff]   ;;  %v1537_v39 = vld [vmem:[%s1727_s28 + $0xd0] ss:$8 sps:$4 sm:$0xff]   ;;  %v1540_v41 = vld [vmem:[%s1727_s28 + $0xe4] ss:$8 sps:$4 sm:$0xff]  }
  0x1e   : > { %1277 = vmatpush3.bf16.msra.mxu0 %v1493_v7  ;;  %1393 = vmatpush3.bf16.msra.mxu1 %v1493_v7  ;;  %v1542_v42 = vld [vmem:[%s1727_s28 + $0x60] ss:$8 sps:$4 sm:$0xff]   ;;  %v1544_v44 = vld [vmem:[%s1727_s28 + $0x74] ss:$8 sps:$4 sm:$0xff]   ;;  %v1548_v46 = vld [vmem:[%s1727_s28 + $0x70] ss:$8 sps:$4 sm:$0xff]  }
  0x1f   : > { %1278 = vmatprep.subr.bf16.mxu0 %v1494_v8  ;;  %1386 = vmatprep.subr.bf16.mxu1 %v1494_v8  ;;  %v1543_v43 = vld [vmem:[%s1727_s28 + $0xe0] ss:$8 sps:$4 sm:$0xff]   ;;  %v1546_v45 = vld [vmem:[%s1727_s28 + $0xf4] ss:$8 sps:$4 sm:$0xff]   ;;  %v1549_v47 = vld [vmem:[%s1727_s28 + $0xf0] ss:$8 sps:$4 sm:$0xff]  }
  0x20   : > { %v1786_v51 = vld [vmem:[%s2032_s2] ss:$0 sm:$0xff]  ;;  %s1195_s28 = sshll.u32 %s202_s21, 8 }
  0x21   : > { %v1791_v55 = vld [vmem:[%s2033_s3] ss:$0 sm:$0xff]  ;;  %s1799_s15 = scalar_lea.vmem [#allocation2], %s1195_s28  }
  0x22   : > { %1279 = vmatpush3.bf16.msra.mxu0 %v1495_v9  ;;  %1394 = vmatpush3.bf16.msra.mxu1 %v1495_v9 }
  0x23   : > { %1280 = vmatprep.subr.bf16.mxu0 %v1496_v10  ;;  %1387 = vmatprep.subr.bf16.mxu1 %v1496_v10 }
  0x26   : > { %1281 = vmatpush3.bf16.msra.mxu0 %v1497_v13  ;;  %1395 = vmatpush3.bf16.msra.mxu1 %v1497_v13 }
  0x27   : > { %1282 = vmatprep.subr.bf16.mxu0 %v1498_v14  ;;  %1388 = vmatprep.subr.bf16.mxu1 %v1498_v14 }
  0x2a   : > { %1283 = vmatpush3.bf16.msra.mxu0 %v1499_v15  ;;  %1396 = vmatpush3.bf16.msra.mxu1 %v1499_v15 }
  0x2b   : > { %1284 = vmatprep.subr.bf16.mxu0 %v1500_v16  ;;  %1389 = vmatprep.subr.bf16.mxu1 %v1500_v16 }
  0x2e   : > { %1285 = vmatpush3.bf16.msra.mxu0 %v1501_v17  ;;  %1397 = vmatpush3.bf16.msra.mxu1 %v1501_v17 }
  0x31   : > { %581 = vmatmul.mubr.bf16.vlgmr.msra.gmra.mxu0 %v1502_v18  ;;  %645 = vmatmul.mubr.bf16.vlgmr.msra.gmra.mxu1 %v1505_v19 }
  0x32   : > { %588 = vmatprep.mubr.bf16.mxu0 %v1508_v20  ;;  %652 = vmatprep.mubr.bf16.mxu1 %v1510_v21 }
  0x39   : > { %589 = vmatmul.mubr.bf16.gmra.mxu0 %v1512_v22  ;;  %653 = vmatmul.mubr.bf16.gmra.mxu1 %v1513_v23 }
  0x3a   : > { %596 = vmatprep.mubr.bf16.mxu0 %v1514_v24  ;;  %660 = vmatprep.mubr.bf16.mxu1 %v1516_v25 }
  0x41   : > { %597 = vmatmul.mubr.bf16.gmra.mxu0 %v1518_v26  ;;  %661 = vmatmul.mubr.bf16.gmra.mxu1 %v1519_v27 }
  0x42   : > { %604 = vmatprep.mubr.bf16.mxu0 %v1520_v28  ;;  %668 = vmatprep.mubr.bf16.mxu1 %v1522_v29 }
  0x49   : > { %605 = vmatmul.mubr.bf16.gmra.mxu0 %v1524_v30  ;;  %669 = vmatmul.mubr.bf16.gmra.mxu1 %v1525_v31 }
  0x4a   : > { %612 = vmatprep.mubr.bf16.mxu0 %v1526_v32  ;;  %676 = vmatprep.mubr.bf16.mxu1 %v1528_v33 }
  0x51   : > { %613 = vmatmul.mubr.bf16.gmra.mxu0 %v1530_v34  ;;  %677 = vmatmul.mubr.bf16.gmra.mxu1 %v1531_v35 }
  0x52   : > { %620 = vmatprep.mubr.bf16.mxu0 %v1532_v36  ;;  %684 = vmatprep.mubr.bf16.mxu1 %v1534_v37 }
  0x59   : > { %621 = vmatmul.mubr.bf16.gmra.mxu0 %v1536_v38  ;;  %685 = vmatmul.mubr.bf16.gmra.mxu1 %v1537_v39 }
  0x5a   : > { %628 = vmatprep.mubr.bf16.mxu0 %v1538_v40  ;;  %692 = vmatprep.mubr.bf16.mxu1 %v1540_v41 }
  0x61   : > { %629 = vmatmul.mubr.bf16.gmra.mxu0 %v1542_v42  ;;  %693 = vmatmul.mubr.bf16.gmra.mxu1 %v1543_v43 }
  0x62   : > { %636 = vmatprep.mubr.bf16.mxu0 %v1544_v44  ;;  %700 = vmatprep.mubr.bf16.mxu1 %v1546_v45 }
  0x69   : > { %637 = vmatmul.mubr.bf16.gmra.mxu0 %v1548_v46  ;;  %701 = vmatmul.mubr.bf16.gmra.mxu1 %v1549_v47 }
  0xf1   : > { %v1286_v48 = vpop.f32.mrf.mxu0  ;;  %v1334_v49 = vpop.f32.mrf.mxu1 }
  0xf3   : > { %v1287_v50 = vpop.f32.mrf.mxu0  ;;  %v1335_v52 = vpop.f32.mrf.mxu1 }
  0xf4   : > { %v1288_v53 = vadd.f32 %v1287_v50, %v1286_v48  ;;  %v1336_v54 = vadd.f32 %v1335_v52, %v1334_v49 }
  0xf5   : > { %v1289_v56 = vpop.f32.mrf.mxu0  ;;  %v1337_v57 = vpop.f32.mrf.mxu1 }
  0xf6   : > { %v716_v58 = vmul.f32 %v1288_v53, %v1786_v51  ;;  %v732_v59 = vmul.f32 %v1336_v54, %v1786_v51 }
  0xf7   : > { %v1290_v60 = vpop.f32.mrf.mxu0  ;;  %v1338_v61 = vpop.f32.mrf.mxu1 }
  0xf8   : > { %v755_v62 = vadd.f32 %v1791_v55, %v716_v58  ;;  %v771_v63 = vadd.f32 %v1791_v55, %v732_v59  ;;  %v1291_v0 = vadd.f32 %v1290_v60, %v1289_v56  ;;  %v1339_v1 = vadd.f32 %v1338_v61, %v1337_v57 }
  0xf9   : > { %v1292_v2 = vpop.f32.mrf.mxu0  ;;  %v1340_v3 = vpop.f32.mrf.mxu1 }
  0xfa   : > { %v787_v4 = vmax.f32 %v755_v62, 0.0  ;;  %v803_v5 = vmax.f32 %v771_v63, 0.0  ;;  %v717_v6 = vmul.f32 %v1291_v0, %v1786_v51  ;;  %v733_v7 = vmul.f32 %v1339_v1, %v1786_v51 }
  0xfb   : > { %v1293_v8 = vpop.f32.mrf.mxu0  ;;  %v1341_v9 = vpop.f32.mrf.mxu1 }
  0xfc   : > { %819 = vst [vmem:[%s1799_s15] sm:$0xff] %v787_v4  ;;  %835 = vst [vmem:[%s1799_s15 + $0x80] sm:$0xff] %v803_v5  ;;  %v756_v10 = vadd.f32 %v1791_v55, %v717_v6  ;;  %v772_v11 = vadd.f32 %v1791_v55, %v733_v7  ;;  %v1294_v12 = vadd.f32 %v1293_v8, %v1292_v2 }
  0xfd   : > { %v1342_v13 = vadd.f32 %v1341_v9, %v1340_v3  ;;  %v1295_v14 = vpop.f32.mrf.mxu0  ;;  %v1343_v15 = vpop.f32.mrf.mxu1 }
  0xfe   : > { %v788_v16 = vmax.f32 %v756_v10, 0.0  ;;  %v804_v17 = vmax.f32 %v772_v11, 0.0  ;;  %v718_v18 = vmul.f32 %v1294_v12, %v1786_v51 }
  0xff   : > { %v734_v19 = vmul.f32 %v1342_v13, %v1786_v51  ;;  %v1296_v20 = vpop.f32.mrf.mxu0  ;;  %v1344_v21 = vpop.f32.mrf.mxu1 }
 0x100   : > { %820 = vst [vmem:[%s1799_s15 + $0x8] sm:$0xff] %v788_v16  ;;  %836 = vst [vmem:[%s1799_s15 + $0x88] sm:$0xff] %v804_v17  ;;  %v757_v22 = vadd.f32 %v1791_v55, %v718_v18  ;;  %v1297_v24 = vadd.f32 %v1296_v20, %v1295_v14  ;;  %v1345_v25 = vadd.f32 %v1344_v21, %v1343_v15 }
 0x101   : > { %v773_v23 = vadd.f32 %v1791_v55, %v734_v19  ;;  %v1298_v26 = vpop.f32.mrf.mxu0  ;;  %v1346_v27 = vpop.f32.mrf.mxu1 }
 0x102   : > { %v789_v28 = vmax.f32 %v757_v22, 0.0  ;;  %v719_v30 = vmul.f32 %v1297_v24, %v1786_v51  ;;  %v735_v31 = vmul.f32 %v1345_v25, %v1786_v51 }
 0x103   : > { %v805_v29 = vmax.f32 %v773_v23, 0.0  ;;  %v1299_v32 = vpop.f32.mrf.mxu0  ;;  %v1347_v33 = vpop.f32.mrf.mxu1 }
 0x104   : > { %821 = vst [vmem:[%s1799_s15 + $0x10] sm:$0xff] %v789_v28  ;;  %v758_v34 = vadd.f32 %v1791_v55, %v719_v30  ;;  %v774_v35 = vadd.f32 %v1791_v55, %v735_v31  ;;  %v1300_v36 = vadd.f32 %v1299_v32, %v1298_v26  ;;  %v1348_v37 = vadd.f32 %v1347_v33, %v1346_v27 }
 0x105   : > { %837 = vst [vmem:[%s1799_s15 + $0x90] sm:$0xff] %v805_v29  ;;  %v1301_v38 = vpop.f32.mrf.mxu0  ;;  %v1349_v39 = vpop.f32.mrf.mxu1 }
 0x106   : > { %v790_v40 = vmax.f32 %v758_v34, 0.0  ;;  %v806_v41 = vmax.f32 %v774_v35, 0.0  ;;  %v720_v42 = vmul.f32 %v1300_v36, %v1786_v51  ;;  %v736_v43 = vmul.f32 %v1348_v37, %v1786_v51 }
 0x107   : > { %v1302_v44 = vpop.f32.mrf.mxu0  ;;  %v1350_v45 = vpop.f32.mrf.mxu1 }
 0x108   : > { %822 = vst [vmem:[%s1799_s15 + $0x18] sm:$0xff] %v790_v40  ;;  %838 = vst [vmem:[%s1799_s15 + $0x98] sm:$0xff] %v806_v41  ;;  %v759_v46 = vadd.f32 %v1791_v55, %v720_v42  ;;  %v775_v47 = vadd.f32 %v1791_v55, %v736_v43  ;;  %v1303_v48 = vadd.f32 %v1302_v44, %v1301_v38 }
 0x109   : > { %v1351_v49 = vadd.f32 %v1350_v45, %v1349_v39  ;;  %v1304_v50 = vpop.f32.mrf.mxu0  ;;  %v1352_v52 = vpop.f32.mrf.mxu1 }
 0x10a   : > { %v791_v53 = vmax.f32 %v759_v46, 0.0  ;;  %v807_v54 = vmax.f32 %v775_v47, 0.0  ;;  %v721_v56 = vmul.f32 %v1303_v48, %v1786_v51 }
 0x10b   : > { %v737_v57 = vmul.f32 %v1351_v49, %v1786_v51  ;;  %v1305_v58 = vpop.f32.mrf.mxu0  ;;  %v1353_v59 = vpop.f32.mrf.mxu1 }
 0x10c   : > { %823 = vst [vmem:[%s1799_s15 + $0x20] sm:$0xff] %v791_v53  ;;  %839 = vst [vmem:[%s1799_s15 + $0xa0] sm:$0xff] %v807_v54  ;;  %v760_v60 = vadd.f32 %v1791_v55, %v721_v56  ;;  %v1306_v62 = vadd.f32 %v1305_v58, %v1304_v50  ;;  %v1354_v63 = vadd.f32 %v1353_v59, %v1352_v52 }
 0x10d   : > { %v776_v61 = vadd.f32 %v1791_v55, %v737_v57  ;;  %v1307_v0 = vpop.f32.mrf.mxu0  ;;  %v1355_v1 = vpop.f32.mrf.mxu1 }
 0x10e   : > { %v792_v2 = vmax.f32 %v760_v60, 0.0  ;;  %v722_v4 = vmul.f32 %v1306_v62, %v1786_v51  ;;  %v738_v5 = vmul.f32 %v1354_v63, %v1786_v51 }
 0x10f   : > { %v808_v3 = vmax.f32 %v776_v61, 0.0  ;;  %v1308_v6 = vpop.f32.mrf.mxu0  ;;  %v1356_v7 = vpop.f32.mrf.mxu1 }
 0x110   : > { %824 = vst [vmem:[%s1799_s15 + $0x28] sm:$0xff] %v792_v2  ;;  %v761_v8 = vadd.f32 %v1791_v55, %v722_v4  ;;  %v777_v9 = vadd.f32 %v1791_v55, %v738_v5  ;;  %v1309_v10 = vadd.f32 %v1308_v6, %v1307_v0  ;;  %v1357_v11 = vadd.f32 %v1356_v7, %v1355_v1 }
 0x111   : > { %840 = vst [vmem:[%s1799_s15 + $0xa8] sm:$0xff] %v808_v3  ;;  %v1310_v12 = vpop.f32.mrf.mxu0  ;;  %v1358_v13 = vpop.f32.mrf.mxu1 }
 0x112   : > { %v793_v14 = vmax.f32 %v761_v8, 0.0  ;;  %v809_v15 = vmax.f32 %v777_v9, 0.0  ;;  %v723_v16 = vmul.f32 %v1309_v10, %v1786_v51  ;;  %v739_v17 = vmul.f32 %v1357_v11, %v1786_v51 }
 0x113   : > { %v1311_v18 = vpop.f32.mrf.mxu0  ;;  %v1359_v19 = vpop.f32.mrf.mxu1 }
 0x114   : > { %825 = vst [vmem:[%s1799_s15 + $0x30] sm:$0xff] %v793_v14  ;;  %841 = vst [vmem:[%s1799_s15 + $0xb0] sm:$0xff] %v809_v15  ;;  %v762_v20 = vadd.f32 %v1791_v55, %v723_v16  ;;  %v778_v21 = vadd.f32 %v1791_v55, %v739_v17  ;;  %v1312_v22 = vadd.f32 %v1311_v18, %v1310_v12 }
 0x115   : > { %v1360_v23 = vadd.f32 %v1359_v19, %v1358_v13  ;;  %v1313_v24 = vpop.f32.mrf.mxu0  ;;  %v1361_v25 = vpop.f32.mrf.mxu1 }
 0x116   : > { %v794_v26 = vmax.f32 %v762_v20, 0.0  ;;  %v810_v27 = vmax.f32 %v778_v21, 0.0  ;;  %v724_v28 = vmul.f32 %v1312_v22, %v1786_v51 }
 0x117   : > { %v740_v29 = vmul.f32 %v1360_v23, %v1786_v51  ;;  %v1314_v30 = vpop.f32.mrf.mxu0  ;;  %v1362_v31 = vpop.f32.mrf.mxu1 }
 0x118   : > { %826 = vst [vmem:[%s1799_s15 + $0x38] sm:$0xff] %v794_v26  ;;  %842 = vst [vmem:[%s1799_s15 + $0xb8] sm:$0xff] %v810_v27  ;;  %v763_v32 = vadd.f32 %v1791_v55, %v724_v28  ;;  %v1315_v34 = vadd.f32 %v1314_v30, %v1313_v24  ;;  %v1363_v35 = vadd.f32 %v1362_v31, %v1361_v25 }
 0x119   : > { %v779_v33 = vadd.f32 %v1791_v55, %v740_v29  ;;  %v1316_v36 = vpop.f32.mrf.mxu0  ;;  %v1364_v37 = vpop.f32.mrf.mxu1 }
 0x11a   : > { %v795_v38 = vmax.f32 %v763_v32, 0.0  ;;  %v725_v40 = vmul.f32 %v1315_v34, %v1786_v51  ;;  %v741_v41 = vmul.f32 %v1363_v35, %v1786_v51 }
 0x11b   : > { %v811_v39 = vmax.f32 %v779_v33, 0.0  ;;  %v1317_v42 = vpop.f32.mrf.mxu0  ;;  %v1365_v43 = vpop.f32.mrf.mxu1 }
 0x11c   : > { %827 = vst [vmem:[%s1799_s15 + $0x40] sm:$0xff] %v795_v38  ;;  %v764_v44 = vadd.f32 %v1791_v55, %v725_v40  ;;  %v780_v45 = vadd.f32 %v1791_v55, %v741_v41  ;;  %v1318_v46 = vadd.f32 %v1317_v42, %v1316_v36  ;;  %v1366_v47 = vadd.f32 %v1365_v43, %v1364_v37 }
 0x11d   : > { %843 = vst [vmem:[%s1799_s15 + $0xc0] sm:$0xff] %v811_v39  ;;  %v1319_v48 = vpop.f32.mrf.mxu0  ;;  %v1367_v49 = vpop.f32.mrf.mxu1 }
 0x11e   : > { %v796_v50 = vmax.f32 %v764_v44, 0.0  ;;  %v812_v52 = vmax.f32 %v780_v45, 0.0  ;;  %v726_v53 = vmul.f32 %v1318_v46, %v1786_v51  ;;  %v742_v54 = vmul.f32 %v1366_v47, %v1786_v51 }
 0x11f   : > { %v1320_v56 = vpop.f32.mrf.mxu0  ;;  %v1368_v57 = vpop.f32.mrf.mxu1 }
 0x120   : > { %828 = vst [vmem:[%s1799_s15 + $0x48] sm:$0xff] %v796_v50  ;;  %844 = vst [vmem:[%s1799_s15 + $0xc8] sm:$0xff] %v812_v52  ;;  %v765_v58 = vadd.f32 %v1791_v55, %v726_v53  ;;  %v781_v59 = vadd.f32 %v1791_v55, %v742_v54  ;;  %v1321_v60 = vadd.f32 %v1320_v56, %v1319_v48 }
 0x121   : > { %v1369_v61 = vadd.f32 %v1368_v57, %v1367_v49  ;;  %v1322_v62 = vpop.f32.mrf.mxu0  ;;  %v1370_v63 = vpop.f32.mrf.mxu1 }
 0x122   : > { %v797_v0 = vmax.f32 %v765_v58, 0.0  ;;  %v813_v1 = vmax.f32 %v781_v59, 0.0  ;;  %v727_v2 = vmul.f32 %v1321_v60, %v1786_v51 }
 0x123   : > { %v743_v3 = vmul.f32 %v1369_v61, %v1786_v51  ;;  %v1323_v4 = vpop.f32.mrf.mxu0  ;;  %v1371_v5 = vpop.f32.mrf.mxu1 }
 0x124   : > { %829 = vst [vmem:[%s1799_s15 + $0x50] sm:$0xff] %v797_v0  ;;  %845 = vst [vmem:[%s1799_s15 + $0xd0] sm:$0xff] %v813_v1  ;;  %v766_v6 = vadd.f32 %v1791_v55, %v727_v2  ;;  %v1324_v8 = vadd.f32 %v1323_v4, %v1322_v62  ;;  %v1372_v9 = vadd.f32 %v1371_v5, %v1370_v63 }
 0x125   : > { %v782_v7 = vadd.f32 %v1791_v55, %v743_v3  ;;  %v1325_v10 = vpop.f32.mrf.mxu0  ;;  %v1373_v11 = vpop.f32.mrf.mxu1 }
 0x126   : > { %v798_v12 = vmax.f32 %v766_v6, 0.0  ;;  %v728_v14 = vmul.f32 %v1324_v8, %v1786_v51  ;;  %v744_v15 = vmul.f32 %v1372_v9, %v1786_v51 }
 0x127   : > { %v814_v13 = vmax.f32 %v782_v7, 0.0  ;;  %v1326_v16 = vpop.f32.mrf.mxu0  ;;  %v1374_v17 = vpop.f32.mrf.mxu1 }
 0x128   : > { %830 = vst [vmem:[%s1799_s15 + $0x58] sm:$0xff] %v798_v12  ;;  %v767_v18 = vadd.f32 %v1791_v55, %v728_v14  ;;  %v783_v19 = vadd.f32 %v1791_v55, %v744_v15  ;;  %v1327_v20 = vadd.f32 %v1326_v16, %v1325_v10  ;;  %v1375_v21 = vadd.f32 %v1374_v17, %v1373_v11 }
 0x129   : > { %846 = vst [vmem:[%s1799_s15 + $0xd8] sm:$0xff] %v814_v13  ;;  %v1328_v22 = vpop.f32.mrf.mxu0  ;;  %v1376_v23 = vpop.f32.mrf.mxu1 }
 0x12a   : > { %v799_v24 = vmax.f32 %v767_v18, 0.0  ;;  %v815_v25 = vmax.f32 %v783_v19, 0.0  ;;  %v729_v26 = vmul.f32 %v1327_v20, %v1786_v51  ;;  %v745_v27 = vmul.f32 %v1375_v21, %v1786_v51 }
 0x12b   : > { %v1329_v28 = vpop.f32.mrf.mxu0  ;;  %v1377_v29 = vpop.f32.mrf.mxu1 }
 0x12c   : > { %831 = vst [vmem:[%s1799_s15 + $0x60] sm:$0xff] %v799_v24  ;;  %847 = vst [vmem:[%s1799_s15 + $0xe0] sm:$0xff] %v815_v25  ;;  %v768_v30 = vadd.f32 %v1791_v55, %v729_v26  ;;  %v784_v31 = vadd.f32 %v1791_v55, %v745_v27  ;;  %v1330_v32 = vadd.f32 %v1329_v28, %v1328_v22 }
 0x12d   : > { %v1378_v33 = vadd.f32 %v1377_v29, %v1376_v23  ;;  %v1331_v34 = vpop.f32.mrf.mxu0  ;;  %v1379_v35 = vpop.f32.mrf.mxu1 }
 0x12e   : > { %v800_v36 = vmax.f32 %v768_v30, 0.0  ;;  %v816_v37 = vmax.f32 %v784_v31, 0.0  ;;  %v730_v38 = vmul.f32 %v1330_v32, %v1786_v51 }
 0x12f   : > { %v746_v39 = vmul.f32 %v1378_v33, %v1786_v51  ;;  %v1332_v40 = vpop.f32.mrf.mxu0  ;;  %v1380_v41 = vpop.f32.mrf.mxu1 }
 0x130   : > { %832 = vst [vmem:[%s1799_s15 + $0x68] sm:$0xff] %v800_v36  ;;  %848 = vst [vmem:[%s1799_s15 + $0xe8] sm:$0xff] %v816_v37  ;;  %v769_v42 = vadd.f32 %v1791_v55, %v730_v38  ;;  %v1333_v44 = vadd.f32 %v1332_v40, %v1331_v34  ;;  %v1381_v45 = vadd.f32 %v1380_v41, %v1379_v35 }
 0x131   : > { %v785_v43 = vadd.f32 %v1791_v55, %v746_v39 }
 0x132   : > { %v801_v46 = vmax.f32 %v769_v42, 0.0  ;;  %v731_v48 = vmul.f32 %v1333_v44, %v1786_v51  ;;  %v747_v49 = vmul.f32 %v1381_v45, %v1786_v51 }
 0x133   : > { %v817_v47 = vmax.f32 %v785_v43, 0.0 }
 0x134   : > { %833 = vst [vmem:[%s1799_s15 + $0x70] sm:$0xff] %v801_v46  ;;  %v770_v50 = vadd.f32 %v1791_v55, %v731_v48  ;;  %v786_v52 = vadd.f32 %v1791_v55, %v747_v49  ;;  %857 = sbr.rel (!%p1688_p4) target bundleno = 361 (0x169), region = 40 }
 0x135   : > { %849 = vst [vmem:[%s1799_s15 + $0xf0] sm:$0xff] %v817_v47 }
 0x136   : > { %v802_v53 = vmax.f32 %v770_v50, 0.0  ;;  %v818_v54 = vmax.f32 %v786_v52, 0.0 }
 0x138   : > { %834 = vst [vmem:[%s1799_s15 + $0x78] sm:$0xff] %v802_v53  ;;  %850 = vst [vmem:[%s1799_s15 + $0xf8] sm:$0xff] %v818_v54 }
 0x139   : > { %s2045_s30 = smov (!%p860_p8, %s859_s30), 32 }
 0x13a   : > { %s1251_s9 = sshll.u32 %s2045_s30, 7 }
 0x13b   : > { %p1254_p9 = scmp.eq.s32.totalorder %s1251_s9, 0 }
 0x13c   : > { %s1904_s10 = sshrl.u32 (!%p1254_p9), %s2045_s30, 5 }
 0x13d   : > { %868 = sbr.rel (%p1254_p9) target bundleno = 361 (0x169), region = 44  ;;  %p1255_p10 = scmp.le.s32.totalorder (!%p1254_p9), %s1904_s10, 0 }
 0x142   : > { %1147 = sbr.rel (%p1255_p10) target bundleno = 344 (0x158), region = 120  ;;  %s2036_s18 = smov (!%p1255_p10), %s1898_s8 }
 0x143   : > { %s2037_s23 = smov (!%p1255_p10), %s1799_s15  ;;  %s1913_s26 = smov (!%p1255_p10), 0  }
 0x144   : > { %s1915_s11 = smov (!%p1255_p10), 0  }
 0x147 LB: >> { %v993_v51 = vld [vmem:[%s1612_s23] sm:$0xff]  ;;  %v995_v55 = vld [vmem:[%s1612_s23 + $0x8] sm:$0xff]  ;;  %v997_v56 = vld [vmem:[%s1612_s23 + $0x10] sm:$0xff]  ;;  %s1057_s12 = sadd.s32 1, %s1616_s26  ;;  %s987_s11 = sadd.s32 1, %s1620_s11   ;;  %s1620_s11 = sphi %s1915_s11, %s987_s11   ;;  %s1616_s26 = sphi %s1913_s26, %s2040_s26   ;;  %s1612_s23 = sphi %s2037_s23, %s2039_s23   ;;  %s1608_s18 = sphi %s2036_s18, %s2038_s18  }
 0x148   : >> { %994 = vst [vmem:[%s1608_s18] sm:$0xff] %v993_v51  ;;  %996 = vst [vmem:[%s1608_s18 + $0x8] sm:$0xff] %v995_v55  ;;  %v999_v57 = vld [vmem:[%s1612_s23 + $0x18] sm:$0xff]  ;;  %v1001_v58 = vld [vmem:[%s1612_s23 + $0x20] sm:$0xff]  ;;  %p1058_p11 = scmp.ge.s32.totalorder %s1057_s12, %s1904_s10  ;;  %p986_p12 = scmp.ge.s32.totalorder %s987_s11, %s1904_s10 }
 0x149   : >> { %998 = vst [vmem:[%s1608_s18 + $0x10] sm:$0xff] %v997_v56  ;;  %v1003_v59 = vld [vmem:[%s1612_s23 + $0x28] sm:$0xff]  ;;  %1000 = vst [vmem:[%s1608_s18 + $0x18] sm:$0xff] %v999_v57  ;;  %v1005_v60 = vld [vmem:[%s1612_s23 + $0x30] sm:$0xff] }
 0x14a   : >> { %1002 = vst [vmem:[%s1608_s18 + $0x20] sm:$0xff] %v1001_v58  ;;  %1004 = vst [vmem:[%s1608_s18 + $0x28] sm:$0xff] %v1003_v59  ;;  %v1007_v61 = vld [vmem:[%s1612_s23 + $0x38] sm:$0xff]  ;;  %v1009_v62 = vld [vmem:[%s1612_s23 + $0x40] sm:$0xff]  ;;  %s2047_s12 = smov (%p1058_p11, %s1057_s12), 0 }
 0x14b   : >> { %1006 = vst [vmem:[%s1608_s18 + $0x30] sm:$0xff] %v1005_v60  ;;  %1008 = vst [vmem:[%s1608_s18 + $0x38] sm:$0xff] %v1007_v61  ;;  %v1011_v63 = vld [vmem:[%s1612_s23 + $0x48] sm:$0xff]  ;;  %v1013_v0 = vld [vmem:[%s1612_s23 + $0x50] sm:$0xff]  ;;  %s1256_s13 = sshll.u32 %s2047_s12, 8  ;;  %s2040_s26 = smov %s2047_s12 }
 0x14c   : >> { %1010 = vst [vmem:[%s1608_s18 + $0x40] sm:$0xff] %v1009_v62  ;;  %v1015_v1 = vld [vmem:[%s1612_s23 + $0x58] sm:$0xff]  ;;  %1012 = vst [vmem:[%s1608_s18 + $0x48] sm:$0xff] %v1011_v63  ;;  %v1017_v2 = vld [vmem:[%s1612_s23 + $0x60] sm:$0xff]  ;;  %s1971_s14 = scalar_lea.vmem %s1799_s15, %s1256_s13 [#allocation2]   ;;  %s1063_s17 = scalar_lea.vmem %s1898_s8, %s1256_s13  }
 0x14d   : >> { %1014 = vst [vmem:[%s1608_s18 + $0x50] sm:$0xff] %v1013_v0  ;;  %1016 = vst [vmem:[%s1608_s18 + $0x58] sm:$0xff] %v1015_v1  ;;  %v1019_v3 = vld [vmem:[%s1612_s23 + $0x68] sm:$0xff]  ;;  %v1021_v4 = vld [vmem:[%s1612_s23 + $0x70] sm:$0xff] }
 0x14e   : >> { %1018 = vst [vmem:[%s1608_s18 + $0x60] sm:$0xff] %v1017_v2  ;;  %1020 = vst [vmem:[%s1608_s18 + $0x68] sm:$0xff] %v1019_v3  ;;  %v1023_v5 = vld [vmem:[%s1612_s23 + $0x78] sm:$0xff]  ;;  %v1025_v6 = vld [vmem:[%s1612_s23 + $0x80] sm:$0xff] }
 0x14f   : >> { %1022 = vst [vmem:[%s1608_s18 + $0x70] sm:$0xff] %v1021_v4  ;;  %v1027_v7 = vld [vmem:[%s1612_s23 + $0x88] sm:$0xff]  ;;  %1024 = vst [vmem:[%s1608_s18 + $0x78] sm:$0xff] %v1023_v5  ;;  %v1029_v8 = vld [vmem:[%s1612_s23 + $0x90] sm:$0xff] }
 0x150   : >> { %1026 = vst [vmem:[%s1608_s18 + $0x80] sm:$0xff] %v1025_v6  ;;  %1028 = vst [vmem:[%s1608_s18 + $0x88] sm:$0xff] %v1027_v7  ;;  %v1031_v9 = vld [vmem:[%s1612_s23 + $0x98] sm:$0xff]  ;;  %v1033_v10 = vld [vmem:[%s1612_s23 + $0xa0] sm:$0xff] }
 0x151   : >> { %1030 = vst [vmem:[%s1608_s18 + $0x90] sm:$0xff] %v1029_v8  ;;  %1032 = vst [vmem:[%s1608_s18 + $0x98] sm:$0xff] %v1031_v9  ;;  %v1035_v11 = vld [vmem:[%s1612_s23 + $0xa8] sm:$0xff]  ;;  %v1037_v12 = vld [vmem:[%s1612_s23 + $0xb0] sm:$0xff] }
 0x152   : >> { %1034 = vst [vmem:[%s1608_s18 + $0xa0] sm:$0xff] %v1033_v10  ;;  %v1039_v13 = vld [vmem:[%s1612_s23 + $0xb8] sm:$0xff]  ;;  %1036 = vst [vmem:[%s1608_s18 + $0xa8] sm:$0xff] %v1035_v11  ;;  %v1041_v14 = vld [vmem:[%s1612_s23 + $0xc0] sm:$0xff] }
 0x153   : >> { %1038 = vst [vmem:[%s1608_s18 + $0xb0] sm:$0xff] %v1037_v12  ;;  %1040 = vst [vmem:[%s1608_s18 + $0xb8] sm:$0xff] %v1039_v13  ;;  %v1043_v15 = vld [vmem:[%s1612_s23 + $0xc8] sm:$0xff]  ;;  %v1045_v16 = vld [vmem:[%s1612_s23 + $0xd0] sm:$0xff]  ;;  %989 = sbr.rel (!%p986_p12) target bundleno = 327 (0x147), region = 126 }
 0x154   : >> { %1042 = vst [vmem:[%s1608_s18 + $0xc0] sm:$0xff] %v1041_v14  ;;  %1044 = vst [vmem:[%s1608_s18 + $0xc8] sm:$0xff] %v1043_v15  ;;  %v1047_v17 = vld [vmem:[%s1612_s23 + $0xd8] sm:$0xff]  ;;  %v1049_v18 = vld [vmem:[%s1612_s23 + $0xe0] sm:$0xff] }
 0x155   : >> { %1046 = vst [vmem:[%s1608_s18 + $0xd0] sm:$0xff] %v1045_v16  ;;  %v1051_v19 = vld [vmem:[%s1612_s23 + $0xe8] sm:$0xff]  ;;  %1048 = vst [vmem:[%s1608_s18 + $0xd8] sm:$0xff] %v1047_v17  ;;  %v1053_v20 = vld [vmem:[%s1612_s23 + $0xf0] sm:$0xff] }
 0x156   : >> { %1050 = vst [vmem:[%s1608_s18 + $0xe0] sm:$0xff] %v1049_v18  ;;  %1052 = vst [vmem:[%s1608_s18 + $0xe8] sm:$0xff] %v1051_v19  ;;  %v1055_v21 = vld [vmem:[%s1612_s23 + $0xf8] sm:$0xff]  ;;  %s2039_s23 = smov %s1971_s14 }
 0x157   : >> { %1054 = vst [vmem:[%s1608_s18 + $0xf0] sm:$0xff] %v1053_v20  ;;  %1056 = vst [vmem:[%s1608_s18 + $0xf8] sm:$0xff] %v1055_v21  ;;  %s2038_s18 = smov %s1063_s17 }
 0x158 PF: > { %s2012_s20 = sand.u32 31, %s2045_s30   ;;  %s1268_s21 = sshll.u32 %s1904_s10, 8 }
 0x159   : > { %s1068_s24 = scalar_lea.vmem %s1799_s15, %s1268_s21 [#allocation2]   ;;  %s1070_s25 = scalar_lea.vmem %s1898_s8, %s1268_s21  }
 0x15a   : > { %p1261_p13 = scmp.le.s32.totalorder %s2012_s20, 0 }
 0x15b   : > { %s1622_s27 = smov (!%p1261_p13), %s1070_s25   ;;  %s1626_s29 = smov (!%p1261_p13), %s1068_s24  }
 0x15c   : > { %1161 = sbr.rel (%p1261_p13) target bundleno = 361 (0x169), region = 131  ;;  %s1630_s28 = smov (!%p1261_p13), 0  }
 0x15d   : > { %s1634_s5 = smov (!%p1261_p13), 0  }
 0x161 LB: >> { %v1080_v22 = vld [vmem:[%s1628_s29] sm:$0xff]  ;;  %s1082_s30 = sadd.s32 1, %s1632_s28  ;;  %s1074_s5 = sadd.s32 1, %s1636_s5   ;;  %s1636_s5 = sphi %s1634_s5, %s1074_s5   ;;  %s1632_s28 = sphi %s1630_s28, %s1631_s28   ;;  %s1628_s29 = sphi %s1626_s29, %s1087_s29   ;;  %s1624_s27 = sphi %s1622_s27, %s1088_s27  }
 0x162   : >> { %1081 = vst [vmem:[%s1624_s27] sm:$0xff] %v1080_v22  ;;  %p1083_p0 = scmp.ge.s32.totalorder %s1082_s30, %s2012_s20  ;;  %p1073_p1 = scmp.ge.s32.totalorder %s1074_s5, %s2012_s20 }
 0x164   : >> { %s2049_s30 = smov (%p1083_p0, %s1082_s30), 0  ;;  %1076 = sbr.rel (!%p1073_p1) target bundleno = 353 (0x161), region = 137 }
 0x165   : >> { %s1262_s15 = sshll.u32 %s2049_s30, 3  ;;  %s1631_s28 = smov %s2049_s30  }
 0x166   : >> { %s1087_s29 = scalar_lea.vmem %s1068_s24, %s1262_s15 [#allocation2]   ;;  %s1088_s27 = scalar_lea.vmem %s1070_s25, %s1262_s15  }
 0x169 PF: > { %p11_p2 = scmp.ge.s32.totalorder %s1678_s19, 4   ;;  %s2041_s15 = smov %s1600_s16 }
 0x16a   : > { %s2042_s16 = smov %s1686_s22  ;;  %s2043_s17 = smov %s1678_s19 }
 0x16b   :  { %13 = sbr.rel (!%p11_p2) target bundleno = 2 (0x2), region = 148 }

</bundles_post_ra>
